<compile_context>
chip_gen: v7x
topology: tpu7x:2x2x1
jax: 0.10.0
libtpu: 0.0.40
codegen_flags: <defaults>
</compile_context>

<pallas_src>
import functools

import jax
import jax.numpy as jnp
from jax import lax
from jax.experimental import pallas as pl
from jax.experimental.pallas import tpu as pltpu


def _bert_encoder_kernel(x_ref, b_ref, w_hbm_ref, o_ref, w_vmem, acc_ref, *, ts, rem):
    # x_ref    : (TB, TS, D)  input tile (input dtype)
    # b_ref    : (1, O_pad)   bias (lane-dense padded)
    # w_hbm_ref: (D, O_pad)   pre-transposed weight, left in HBM (memory_space=pl.ANY)
    # o_ref    : (TB, O_pad)  output tile (same block across the S axis)
    # w_vmem   : (D, O_pad)   VMEM scratch holding a single copy of the weight
    # acc_ref  : (TB, D) f32  running-max accumulator
    si = pl.program_id(1)
    last = pl.num_programs(1) - 1

    @pl.when(si == 0)
    def _init():
        acc_ref[...] = jnp.full(acc_ref.shape, -jnp.inf, dtype=acc_ref.dtype)
        # Single VMEM copy of the (small) weight; re-done once per B tile so it is
        # correct under megacore sharding of the "parallel" B axis.
        pltpu.sync_copy(w_hbm_ref, w_vmem)

    x = x_ref[...]                                   # stay in the input dtype
    if rem != 0:                                     # static: S % TS != 0
        # Ragged last S tile: rows >= S are the block overhang (unspecified data);
        # mask them to -inf so the running max is unaffected.  No wrapper-side pad of x.
        limit = jnp.where(si == last, rem, ts)
        row = lax.broadcasted_iota(jnp.int32, x.shape[1:], 0)        # (TS, D)
        x = jnp.where((row < limit)[None, :, :], x,
                      jnp.array(-jnp.inf, dtype=x.dtype))

    # Reduce first, cast only the small (TB, D) result (keeps bf16 tiles natively packed).
    acc_ref[...] = jnp.maximum(acc_ref[...], jnp.max(x, axis=1).astype(jnp.float32))

    @pl.when(si == last)
    def _finalize():
        w = w_vmem[...]
        # pooled max values of a bf16 input are exactly bf16-representable, so the cast to
        # the weight dtype is lossless for the bf16 path; the MXU accumulates in f32.
        y = jnp.dot(acc_ref[...].astype(w.dtype), w,
                    preferred_element_type=jnp.float32)               # (TB, O_pad)
        o_ref[...] = (y + b_ref[...].astype(jnp.float32)).astype(o_ref.dtype)


def _vmem_capacity_bytes():
    try:
        cap = getattr(pltpu.get_tpu_info(), "vmem_capacity_bytes", None)
        if cap:
            return int(cap)
    except Exception:
        pass
    try:
        kind = jax.devices()[0].device_kind.lower()
    except Exception:
        kind = ""
    if "v5" in kind or "v6" in kind:
        return 128 * 1024 * 1024        # v5e / v6e: 128 MiB VMEM
    return 64 * 1024 * 1024             # conservative default (v7x: 64 MiB)


def _choose_tiles(B, S, D, x_itemsize, vmem_cap):
    # Sublane packing: f32 -> 8 rows, bf16 -> 16, int8/fp8 -> 32.
    ts_align = 8 * max(1, 4 // max(1, x_itemsize))
    # Aim for >=2 B blocks (each a multiple of 8) when the batch allows it, so both
    # v7x TensorCores get work on the "parallel" axis; tiny batches use TB == B.
    if B <= 8:
        TB = B
    else:
        TB = min(128, ((((B + 1) // 2) + 7) // 8) * 8)
    # Generation-scaled streaming budget: ~cap/5 per x buffer (double-buffered),
    # i.e. ~25 MiB/buffer on 128-MiB chips, ~12 MiB/buffer on v7x.
    x_budget = max(4 << 20, vmem_cap // 5)
    max_ts = max(ts_align, x_budget // max(1, TB * D * x_itemsize))
    TS = S if S <= max_ts else max(ts_align, (max_ts // ts_align) * ts_align)
    return TB, TS


def bert_encoder_forward(bert_fea, weight, bias, *, tile_s=None):
    """bert_fea: (B, S, D); weight: (out_dim, bert_dim) PyTorch layout; bias: (out_dim,)."""
    B, S, D = bert_fea.shape
    O = weight.shape[0]
    x_itemsize = jnp.dtype(bert_fea.dtype).itemsize

    vmem_cap = _vmem_capacity_bytes()
    TB, TS = _choose_tiles(B, S, D, x_itemsize, vmem_cap)
    if tile_s is not None:
        TS = tile_s

    O_pad = pl.cdiv(O, 128) * 128                    # lane-dense output / bias

    # One-time tiny host-side prep: transpose the weight to (D, O_pad) for a standard
    # (K, N) MXU contraction and pad O to a lane multiple.  x itself is never padded.
    w_t = weight.T
    if O_pad != O:
        w_t = jnp.pad(w_t, ((0, 0), (0, O_pad - O)))
        b2d = jnp.pad(bias, (0, O_pad - O)).reshape(1, O_pad)
    else:
        b2d = bias.reshape(1, O_pad)

    w_itemsize = jnp.dtype(w_t.dtype).itemsize
    out_itemsize = x_itemsize

    vmem_need = (2 * TB * TS * D * x_itemsize             # double-buffered x stream
                 + D * O_pad * w_itemsize                 # single weight copy (scratch)
                 + 2 * 8 * O_pad * w_itemsize             # bias (tiny, double-buffered)
                 + 2 * max(TB, 8) * O_pad * out_itemsize  # output tile
                 + max(TB, 8) * max(D, 128) * 4)          # f32 accumulator
    vmem_limit = int(min(max(2 * vmem_need, 32 << 20), int(0.82 * vmem_cap)))

    cost = pl.CostEstimate(
        flops=2 * B * D * O_pad,
        transcendentals=0,
        bytes_accessed=(B * S * D * x_itemsize
                        + D * O_pad * w_itemsize
                        + O_pad * w_itemsize
                        + B * O_pad * out_itemsize),
    )

    kernel = functools.partial(_bert_encoder_kernel, ts=TS, rem=S % TS)

    out = pl.pallas_call(
        kernel,
        out_shape=jax.ShapeDtypeStruct((B, O_pad), bert_fea.dtype),
        grid_spec=pltpu.PrefetchScalarGridSpec(
            num_scalar_prefetch=0,
            grid=(pl.cdiv(B, TB), pl.cdiv(S, TS)),
            in_specs=[
                pl.BlockSpec((TB, TS, D), lambda bi, si: (bi, si, 0)),
                pl.BlockSpec((1, O_pad), lambda bi, si: (0, 0)),
                pl.BlockSpec(memory_space=pl.ANY),        # weight stays in HBM
            ],
            out_specs=pl.BlockSpec((TB, O_pad), lambda bi, si: (bi, 0)),
            scratch_shapes=[
                pltpu.VMEM((D, O_pad), w_t.dtype),        # single weight copy
                pltpu.VMEM((TB, D), jnp.float32),         # running-max accumulator
            ],
        ),
        compiler_params=pltpu.CompilerParams(
            dimension_semantics=("parallel", "arbitrary"),
            vmem_limit_bytes=vmem_limit,
        ),
        cost_estimate=cost,
    )(bert_fea, b2d, w_t)

    return out[:, :O]


def reference_forward(bert_fea, weight, bias):
    pooled = jnp.max(bert_fea, axis=1)               # (B, D)
    return pooled @ weight.T + bias                  # (B, O)


if __name__ == "__main__":
    key = jax.random.PRNGKey(0)
    k_x, k_w, k_b, k_x2, k_x3 = jax.random.split(key, 5)

    # Small shapes consistent with the module: batch=2, seq=8, bert_dim=32, out_dim=16
    B, S, bert_dim, out_dim = 2, 8, 32, 16

    bert_fea = jax.random.normal(k_x, (B, S, bert_dim), dtype=jnp.float32)

    # Deterministic parameter init (emulating init_linear_weight_bias with a simple
    # xavier-uniform style scheme; PyTorch Linear weight is (out, in)).
    bound = (6.0 / (bert_dim + out_dim)) ** 0.5
    weight = jax.random.uniform(k_w, (out_dim, bert_dim), dtype=jnp.float32,
                                minval=-bound, maxval=bound)
    bias = jax.random.uniform(k_b, (out_dim,), dtype=jnp.float32,
                              minval=-0.1, maxval=0.1)

    # 1) default tiling (single S tile at these shapes)
    out = jax.block_until_ready(bert_encoder_forward(bert_fea, weight, bias))
    ref = reference_forward(bert_fea, weight, bias)
    assert out.shape == (B, out_dim), out.shape
    assert jnp.allclose(out, ref, atol=1e-5, rtol=1e-5), \
        f"max abs err {jnp.max(jnp.abs(out - ref))}"

    # 2) ragged S (23 not divisible by the 8-row S tile) -> exercises the in-kernel
    #    tail masking and the multi-step running-max accumulator, with no jnp.pad of x.
    B2, S2 = 3, 23
    x2 = jax.random.normal(k_x2, (B2, S2, bert_dim), dtype=jnp.float32)
    out2 = jax.block_until_ready(bert_encoder_forward(x2, weight, bias, tile_s=8))
    ref2 = reference_forward(x2, weight, bias)
    assert out2.shape == (B2, out_dim), out2.shape
    assert jnp.allclose(out2, ref2, atol=1e-5, rtol=1e-5), \
        f"max abs err {jnp.max(jnp.abs(out2 - ref2))}"

    # 3) bf16 path: reduce-before-cast, bf16-aligned S tile, ragged B tile
    #    (B=12 with TB=8 -> overhang output rows are discarded by Pallas).
    B3, S3 = 12, 20
    x3 = jax.random.normal(k_x3, (B3, S3, bert_dim), dtype=jnp.float32).astype(jnp.bfloat16)
    w3 = weight.astype(jnp.bfloat16)
    b3 = bias.astype(jnp.bfloat16)
    out3 = jax.block_until_ready(bert_encoder_forward(x3, w3, b3, tile_s=16))
    ref3 = reference_forward(x3.astype(jnp.float32), w3.astype(jnp.float32),
                             b3.astype(jnp.float32))
    assert out3.shape == (B3, out_dim), out3.shape
    assert jnp.allclose(out3.astype(jnp.float32), ref3, atol=5e-2, rtol=5e-2), \
        f"max abs err {jnp.max(jnp.abs(out3.astype(jnp.float32) - ref3))}"

    print("KERNEL_OK")
</pallas_src>

<mosaic_0001>
module attributes {stable_mosaic.version = 11 : i64} {
  func.func @_bert_encoder_kernel(%arg0: i32, %arg1: i32, %arg2: memref<2x8x32xf32, #tpu.memory_space<vmem>>, %arg3: memref<1x128xf32, #tpu.memory_space<vmem>>, %arg4: memref<32x128xf32, #tpu.memory_space<any>>, %arg5: memref<2x128xf32, #tpu.memory_space<vmem>>, %arg6: memref<32x128xf32, #tpu.memory_space<vmem>>, %arg7: memref<2x32xf32, #tpu.memory_space<vmem>>) attributes {dimension_semantics = [#tpu.dimension_semantics<parallel>, #tpu.dimension_semantics<arbitrary>], iteration_bounds = array<i64: 1, 1>, scalar_prefetch = 0 : i64, scratch_operands = 2 : i64, tpu.core_type = #tpu.core_type<tc>, window_params = [{transform_indices = @transform_0, window_bounds = array<i64: 2, 8, 32>}, {pipeline_mode = #tpu.pipeline_mode<synchronous>, transform_indices = @transform_1, window_bounds = array<i64: 1, 128>}, {}, {transform_indices = @transform_3, window_bounds = array<i64: 2, 128>}]} {
    %c0_i32 = arith.constant 0 : i32
    %0 = arith.cmpi eq, %arg1, %c0_i32 : i32
    %1 = arith.extui %0 : i1 to i32
    %c0_i32_0 = arith.constant 0 : i32
    %2 = arith.cmpi ne, %1, %c0_i32_0 : i32
    scf.if %2 {
      %cst_9 = arith.constant 0xFF800000 : f32
      %11 = vector.broadcast %cst_9 : f32 to vector<2x32xf32>
      %c0_10 = arith.constant 0 : index
      %c0_11 = arith.constant 0 : index
      %12 = vector.load %arg7[%c0_10, %c0_11] : memref<2x32xf32, #tpu.memory_space<vmem>>, vector<2x32xf32>
      tpu.vector_store %arg7[%c0_10, %c0_11], %11 {strides = array<i32>} : memref<2x32xf32, #tpu.memory_space<vmem>>, vector<2x32xf32>,
      "tpu.region"() ({
        %13 = tpu.sem_alloc : memref<!tpu.dma_semaphore, #tpu.memory_space<semaphore_mem>>
        tpu.enqueue_dma source(%arg4 : memref<32x128xf32, #tpu.memory_space<any>>) target(%arg6 : memref<32x128xf32, #tpu.memory_space<vmem>>) target_semaphore(%13 : memref<!tpu.dma_semaphore, #tpu.memory_space<semaphore_mem>>)
        tpu.wait_dma2 semaphore(%13 : memref<!tpu.dma_semaphore, #tpu.memory_space<semaphore_mem>>) src(%arg4 : memref<32x128xf32, #tpu.memory_space<any>>) dst(%arg6 : memref<32x128xf32, #tpu.memory_space<vmem>>)
        tpu.yield
      }) : () -> ()
    } else {
    }
    %c0 = arith.constant 0 : index
    %c0_1 = arith.constant 0 : index
    %c0_2 = arith.constant 0 : index
    %3 = vector.load %arg2[%c0, %c0_1, %c0_2] : memref<2x8x32xf32, #tpu.memory_space<vmem>>, vector<2x8x32xf32>
    %c0_3 = arith.constant 0 : index
    %c0_4 = arith.constant 0 : index
    %4 = vector.load %arg7[%c0_3, %c0_4] : memref<2x32xf32, #tpu.memory_space<vmem>>, vector<2x32xf32>
    %cst = arith.constant dense<0xFF800000> : vector<2x32xf32>
    %5 = vector.multi_reduction <maximumf>, %3, %cst [1] : vector<2x8x32xf32> to vector<2x32xf32>
    %6 = arith.maximumf %4, %5 : vector<2x32xf32>
    %c0_5 = arith.constant 0 : index
    %c0_6 = arith.constant 0 : index
    %7 = vector.load %arg7[%c0_5, %c0_6] : memref<2x32xf32, #tpu.memory_space<vmem>>, vector<2x32xf32>
    tpu.vector_store %arg7[%c0_5, %c0_6], %6 {strides = array<i32>} : memref<2x32xf32, #tpu.memory_space<vmem>>, vector<2x32xf32>,
    %c0_i32_7 = arith.constant 0 : i32
    %8 = arith.cmpi eq, %arg1, %c0_i32_7 : i32
    %9 = arith.extui %8 : i1 to i32
    %c0_i32_8 = arith.constant 0 : i32
    %10 = arith.cmpi ne, %9, %c0_i32_8 : i32
    scf.if %10 {
      %c0_9 = arith.constant 0 : index
      %c0_10 = arith.constant 0 : index
      %11 = vector.load %arg6[%c0_9, %c0_10] : memref<32x128xf32, #tpu.memory_space<vmem>>, vector<32x128xf32>
      %c0_11 = arith.constant 0 : index
      %c0_12 = arith.constant 0 : index
      %12 = vector.load %arg7[%c0_11, %c0_12] : memref<2x32xf32, #tpu.memory_space<vmem>>, vector<2x32xf32>
      %cst_13 = arith.constant dense<0.000000e+00> : vector<2x128xf32>
      %13 = tpu.matmul %12, %11, %cst_13 {dimension_numbers = #tpu.dot_dimension_numbers<[1], [0], [0], [1], [0, 0, 1, 1], [], []>} : vector<2x32xf32>, vector<32x128xf32>, vector<2x128xf32> -> vector<2x128xf32>
      %c0_14 = arith.constant 0 : index
      %c0_15 = arith.constant 0 : index
      %14 = vector.load %arg3[%c0_14, %c0_15] : memref<1x128xf32, #tpu.memory_space<vmem>>, vector<1x128xf32>
      %15 = vector.broadcast %14 : vector<1x128xf32> to vector<2x128xf32>
      %16 = arith.addf %13, %15 : vector<2x128xf32>
      %c0_16 = arith.constant 0 : index
      %c0_17 = arith.constant 0 : index
      %17 = vector.load %arg5[%c0_16, %c0_17] : memref<2x128xf32, #tpu.memory_space<vmem>>, vector<2x128xf32>
      tpu.vector_store %arg5[%c0_16, %c0_17], %16 {strides = array<i32>} : memref<2x128xf32, #tpu.memory_space<vmem>>, vector<2x128xf32>,
    } else {
    }
    return
  }
  func.func @transform_0(%arg0: i32, %arg1: i32) -> (i32, i32, i32) {
    %c0_i32 = arith.constant 0 : i32
    %c0_i32_0 = arith.constant 0 : i32
    return %arg0, %arg1, %c0_i32 : i32, i32, i32
  }
  func.func @transform_1(%arg0: i32, %arg1: i32) -> (i32, i32) {
    %c0_i32 = arith.constant 0 : i32
    %c0_i32_0 = arith.constant 0 : i32
    %c0_i32_1 = arith.constant 0 : i32
    return %c0_i32, %c0_i32_0 : i32, i32
  }
  func.func @transform_3(%arg0: i32, %arg1: i32) -> (i32, i32) {
    %c0_i32 = arith.constant 0 : i32
    %c0_i32_0 = arith.constant 0 : i32
    return %arg0, %c0_i32 : i32, i32
  }
}

</mosaic_0001>

<bundles_post_ra>
// kernel: tpu_custom_call.1
= control target key start
LH: loop header
LB: loop body
LE: loop exit
PB: predicated region body
PF: predicated region fallthrough
CT: control target
= control target key end

     0   :  { %8 = vsyncpa [#allocation5], 0  ;;  %s355_s0 = inlined_call_operand.hbm [shape: f32[2,8,32], index: 0, kind: input, shape index: {}]   ;;  %s356_s1 = inlined_call_operand.vmem [shape: f32[1,128], index: 1, kind: input, shape index: {}]   ;;  %s357_s2 = inlined_call_operand.hbm [shape: f32[32,128], index: 2, kind: input, shape index: {}]   ;;  %s358_s3 = inlined_call_operand.hbm [shape: f32[2,128], index: 3, kind: output, shape index: {}]  }
   0x1   :  { %9 = vsyncpa [#allocation6], 0  ;;  %s282_s12 = smov [#allocation4]   ;;  %s210_s16 = scalar_lea.hbm %s355_s0, 256 }
   0x2   :  { %s15_s13 = sshll.u32 %s282_s12, 4  ;;  %p211_p0 = scmp.ne.s32.totalorder %s355_s0, %s210_s16  ;;  %s16_s13 = int_to_ptr.vmem [resolvable:$true] %s15_s13 }
   0x3   :  { %p214_p1 = scmp.lt.u32.totalorder %s210_s16, %s355_s0 }
   0x5   :  { %p216_p2 = pnand %p214_p1, %p211_p0 }
   0x7   :  { %219 = shalt.err (!%p216_p2)
}
   0x8   :  { %s220_s21 = scalar_lea.vmem %s16_s13, 256  ;;  %p225_p4 = scmp.lt.s32.totalorder %s16_s13, %s16_s13 }
   0x9   :  { %p221_p3 = scmp.ne.s32.totalorder %s16_s13, %s220_s21  ;;  %p226_p5 = scmp.lt.s32.totalorder %s220_s21, %s220_s21 }
   0xb   :  { %p227_p6 = por %p226_p5, %p225_p4 }
   0xd   :  { %p228_p7 = pnand %p227_p6, %p221_p3 }
   0xf   :  { %231 = shalt.err (!%p228_p7)
}
  0x10   :  { %s283_s22 = smov 128   ;;  %s284_s23 = smov 8  }
  0x11   :  { %21 = dma.hbm_to_vmem [thread:$0]  %s355_s0, 256, %s16_s13, [#allocation5], %s283_s22, %s283_s22, %s284_s23  }
  0x12   :  { %276 = dma.done.wait [#allocation5], 256  }
  0x13   :  { %277 = vsyncadd [#allocation5], 4294967040  ;;  %vm31_vm0 = vcmask 254976   ;;  %v285_v0 = vmov -inf  }
  0x14   :  { %32 = vst.msk [vmem:[#allocation3] sm:$0x3] %vm31_vm0, %v285_v0 }
  0x15   :  { %s286_s26 = smov [#allocation2]   ;;  %s232_s30 = scalar_lea.hbm %s357_s2, 512 }
  0x16   :  { %s40_s27 = sshll.u32 %s286_s26, 4  ;;  %p233_p8 = scmp.ne.s32.totalorder %s357_s2, %s232_s30  ;;  %s41_s27 = int_to_ptr.vmem [resolvable:$true] %s40_s27 }
  0x17   :  { %p236_p9 = scmp.lt.u32.totalorder %s232_s30, %s357_s2 }
  0x19   :  { %p238_p10 = pnand %p236_p9, %p233_p8 }
  0x1b   :  { %241 = shalt.err (!%p238_p10)  }
  0x1c   :  { %s242_s0 = scalar_lea.vmem %s41_s27, 512  ;;  %p247_p12 = scmp.lt.s32.totalorder %s41_s27, %s41_s27 }
  0x1d   :  { %p243_p11 = scmp.ne.s32.totalorder %s41_s27, %s242_s0  ;;  %p248_p13 = scmp.lt.s32.totalorder %s242_s0, %s242_s0 }
  0x1f   :  { %p249_p0 = por %p248_p13, %p247_p12 }
  0x21   :  { %p250_p1 = pnand %p249_p0, %p243_p11 }
  0x23   :  { %253 = shalt.err (!%p250_p1)  }
  0x24   :  { %43 = dma.hbm_to_vmem [thread:$0]  %s357_s2, 512, %s41_s27, [#allocation8] }
  0x25   :  { %278 = dma.done.wait [#allocation8], 512 }
  0x26   :  { %279 = vsyncadd [#allocation8], 4294966784  ;;  %v76_v1 = vld [vmem:[#allocation2] sm:$0xff]  ;;  %v77_v2 = vld [vmem:[#allocation2 + $0x8] sm:$0xff]  ;;  %v287_v4 = vmov 0.0|0.0   ;;  %vm288_vm1 = vmmov 0  }
  0x27   :  { %v78_v3 = vld [vmem:[#allocation2 + $0x10] sm:$0xff]  ;;  %195 = vmatprep.subr.bf16.mxu0 %v287_v4  ;;  %v196_v5 = vpack.c.bf16 %v77_v2, %v76_v1  ;;  %v79_v6 = vld [vmem:[#allocation2 + $0x18] sm:$0xff]  ;;  %v289_v7 = vmov 0.0   ;;  %v47_v8 = vld [vmem:[#allocation4] sm:$0xff]  ;;  %vm50_vm2 = vcmask 261120   ;;  %vm67_vm3 = vcmask 1041409  }
  0x28   :  { %192 = vmatprep.mubr.msk.f32.mxu0 %vm288_vm1, %v289_v7  ;;  %v48_v9 = vld [vmem:[#allocation4 + $0x8] sm:$0xff]  ;;  %v51_v10 = vsel %vm50_vm2, %v47_v8, -inf  ;;  %v199_v12 = vpack.c.bf16 %v79_v6, %v78_v3  ;;  %v49_v23 = vld [vmem:[#allocation3] sm:$0x3]  ;;  %s290_s11 = smov [#allocation7]  }
  0x29   :  { %v58_v11 = vsel %vm50_vm2, %v48_v9, -inf  ;;  %197 = vmatpush3.bf16.msra.mxu0 %v196_v5  ;;  %v52_v13 = vrot.slane %v51_v10, 4  ;;  %v177_v29 = vld [vmem:[%s356_s1] ss:$0 sm:$0xff]  ;;  %s168_s12 = sshll.u32 %s290_s11, 4  ;;  %s169_s12 = int_to_ptr.vmem [resolvable:$true] %s168_s12 }
  0x2a   :  { %v59_v14 = vrot.slane %v58_v11, 4  ;;  %198 = vmatprep.subr.bf16.mxu0 %v287_v4  ;;  %s254_s13 = scalar_lea.vmem %s169_s12, 32  ;;  %p259_p3 = scmp.lt.s32.totalorder %s169_s12, %s169_s12 }
  0x2b   :  { %v53_v15 = vmax.f32 %v51_v10, %v52_v13  ;;  %p255_p2 = scmp.ne.s32.totalorder %s169_s12, %s254_s13  ;;  %p260_p4 = scmp.lt.s32.totalorder %s254_s13, %s254_s13 }
  0x2c   :  { %v60_v16 = vmax.f32 %v58_v11, %v59_v14 }
  0x2d   :  { %200 = vmatpush3.bf16.msra.mxu0 %v199_v12  ;;  %v54_v17 = vrot.slane %v53_v15, 2  ;;  %p261_p5 = por %p260_p4, %p259_p3 }
  0x2e   :  { %v61_v18 = vrot.slane %v60_v16, 2 }
  0x2f   :  { %v55_v19 = vmax.f32 %v53_v15, %v54_v17  ;;  %p262_p6 = pnand %p261_p5, %p255_p2 }
  0x30   :  { %v62_v20 = vmax.f32 %v60_v16, %v61_v18 }
  0x31   :  { %v56_v21 = vrot.slane %v55_v19, 1 }
  0x32   :  { %v63_v22 = vrot.slane %v62_v20, 1 }
  0x33   :  { %v57_v24 = vmax.f32 %v55_v19, %v56_v21 }
  0x34   :  { %v64_v25 = vmax.f32 %v62_v20, %v63_v22 }
  0x36   :  { %v68_v26 = vsel %vm67_vm3, %v64_v25, %v57_v24 }
  0x37   :  { %v70_v27 = vmax.f32 %v49_v23, %v68_v26 }
  0x39   :  { %72 = vst.msk [vmem:[#allocation3] sm:$0x3] %vm31_vm0, %v70_v27 }
  0x40   :  { %v80_v28 = vld [vmem:[#allocation3] sm:$0x3] }
  0x41   :  { %193 = vmatmul.mubr.msk.f32.vlgmr.msra.gmra.mrb[0].mxu0 %vm50_vm2, %v80_v28 }
 0x114   :  { %v157_v30 = vpop.f32.mrb[0].mxu0 }
 0x115   :  { %v158_v31 = vadd.f32 %v177_v29, %v157_v30  ;;  %v194_v32 = vpop.f32.mrb[1].mxu0 }
 0x117   :  { %161 = vst [vmem:[#allocation7] sm:$0x3] %v158_v31 }
 0x118   :  { %265 = shalt.err (!%p262_p6)
}
 0x119   :  { %s266_s16 = scalar_lea.hbm %s358_s3, 32 }
 0x11a   :  { %p267_p7 = scmp.ne.s32.totalorder %s358_s3, %s266_s16  ;;  %p270_p8 = scmp.lt.u32.totalorder %s266_s16, %s358_s3 }
 0x11c   :  { %p272_p9 = pnand %p270_p8, %p267_p7 }
 0x11e   :  { %275 = shalt.err (!%p272_p9)
}
 0x11f   :  { %171 = dma.vmem_to_hbm [thread:$0]  %s169_s12, 32, %s358_s3, [#allocation6]  }
 0x120   :  { %280 = dma.done.wait [#allocation6], 32  }
 0x121   :  { %281 = vsyncadd [#allocation6], 4294967264 }
 0x122   :  { %175 = vsyncpa [#allocation5], 1 }
 0x123   :  { %176 = vsyncpa [#allocation6], 1 }

</bundles_post_ra>
